<compile_context>
chip_gen: v7x
topology: tpu7x:2x2x1
jax: 0.10.0
libtpu: 0.0.40
codegen_flags: <defaults>
</compile_context>

<pallas_src>
import functools

import jax
import jax.numpy as jnp
from jax import lax
from jax.experimental import pallas as pl
from jax.experimental.pallas import tpu as pltpu


def _round_up(a, b):
    return (a + b - 1) // b * b


def _resblock_kernel(x_ref, w_ref, wr_ref, b_ref, br_ref, m_ref, out_ref, *, W):
    """One grid step: `nb` images, per-tap MXU accumulation.

    x_ref  : (nb, Cin_p, HWp)     input, channels on sublanes, H*W on lanes
    w_ref  : (9, Cout_p, Cin_p)   BN-folded 3x3 weights, one tile per tap
    wr_ref : (Cout_p, Cin_p)      BN-folded 1x1 residual weights
    b_ref  : (Cout_p, 1)  f32     BN-folded main-branch bias
    br_ref : (Cout_p, 1)  f32     BN-folded residual-branch bias
    m_ref  : (9, 1, HWp)          0/1 border + pad masks per tap (compute dtype)
    out_ref: (nb, Cout_p, HWp)
    """
    nb, _, hwp = x_ref.shape
    cout_p = w_ref.shape[1]

    offsets = [(dy, dx) for dy in (-1, 0, 1) for dx in (-1, 0, 1)]

    # Hoist loop-invariant loads out of the per-image loop.
    w_taps = [w_ref[t] for t in range(9)]           # each (Cout_p, Cin_p)
    masks = [m_ref[t] for t in range(9)]            # each (1, HWp)
    w_res = wr_ref[...]                             # (Cout_p, Cin_p)
    b_main = b_ref[...]                             # (Cout_p, 1) f32
    b_res = br_ref[...]                             # (Cout_p, 1) f32

    for n in range(nb):
        xi = x_ref[n]                               # (Cin_p, HWp)
        acc = jnp.zeros((cout_p, hwp), jnp.float32)
        for t, (dy, dx) in enumerate(offsets):
            s = dy * W + dx
            if s == 0:
                tap = xi                            # center tap: mask all-ones
            else:
                # tap[:, p] = xi[:, (p + s) % hwp]; any wrap happens only at
                # positions where the border mask is 0.
                tap = pltpu.roll(xi, (-s) % hwp, axis=1) * masks[t]
            acc = acc + jnp.dot(w_taps[t], tap,
                                preferred_element_type=jnp.float32)
        res = jnp.dot(w_res, xi, preferred_element_type=jnp.float32) + b_res
        out = jnp.maximum(acc + b_main, 0.0) + res  # ReLU(main) + residual
        out_ref[n] = out.astype(out_ref.dtype)


def residual_conv_block_forward(x, params, *, compute_dtype=jnp.float32,
                                images_per_step=None, eps=1e-5):
    """Pallas forward for ResidualConvBlock (eval-mode BN). NCHW in / NCHW out."""
    N, Cin, H, W = x.shape
    Cout = params["w3"].shape[0]
    HW = H * W

    in_item = jnp.dtype(compute_dtype).itemsize
    out_item = jnp.dtype(x.dtype).itemsize
    sub = 32 // in_item                       # sublane packing: 8 f32, 16 bf16
    Cin_p = _round_up(Cin, sub)
    Cout_p = _round_up(Cout, sub)
    HWp = _round_up(HW, 128)                  # lane-tile aligned spatial axis

    # ---- fold eval-mode BatchNorms into the conv weights/biases (glue) ----
    s1 = params["g1"] * lax.rsqrt(params["rv1"] + eps)          # main BN
    s2 = params["g2"] * lax.rsqrt(params["rv2"] + eps)          # residual BN
    w3f = params["w3"] * s1[:, None, None, None]                # (Co,Ci,3,3)
    w_taps = jnp.transpose(w3f, (2, 3, 0, 1)).reshape(9, Cout, Cin)
    b_main = (params["b3"] - params["rm1"]) * s1 + params["be1"]
    w_res = params["w1"] * s2[:, None]
    b_res = (params["b1"] - params["rm2"]) * s2 + params["be2"]

    # Pad to tile-aligned shapes and ship already in compute dtype.
    w_taps = jnp.pad(w_taps, ((0, 0), (0, Cout_p - Cout),
                              (0, Cin_p - Cin))).astype(compute_dtype)
    w_res = jnp.pad(w_res, ((0, Cout_p - Cout),
                            (0, Cin_p - Cin))).astype(compute_dtype)
    b_main = jnp.pad(b_main, (0, Cout_p - Cout))[:, None].astype(jnp.float32)
    b_res = jnp.pad(b_res, (0, Cout_p - Cout))[:, None].astype(jnp.float32)

    # ---- 0/1 border masks (plus padded-tail zeros) for the nine taps ----
    hh = jnp.arange(H)[:, None]
    ww = jnp.arange(W)[None, :]
    masks = []
    for dy in (-1, 0, 1):
        for dx in (-1, 0, 1):
            m = ((hh + dy >= 0) & (hh + dy < H) &
                 (ww + dx >= 0) & (ww + dx < W)).reshape(HW)
            m = jnp.pad(m, (0, HWp - HW))
            masks.append(m.reshape(1, 1, HWp))
    mask = jnp.concatenate(masks, axis=0).astype(compute_dtype)   # (9,1,HWp)

    # ---- input: pad channels / spatial to the tile-aligned slab ----
    x_flat = x.reshape(N, Cin, HW)
    if (Cin_p, HWp) != (Cin, HW):
        x_flat = jnp.pad(x_flat, ((0, 0), (0, Cin_p - Cin), (0, HWp - HW)))
    x_flat = x_flat.astype(compute_dtype)

    # ---- generation-aware images-per-step + VMEM limit ----
    try:
        vmem_cap = int(pltpu.get_tpu_info().vmem_capacity_bytes)
    except Exception:
        vmem_cap = 64 << 20                  # conservative (v7x-sized) default
    per_img = HWp * (2 * Cin_p * in_item     # double-buffered input block
                     + 2 * Cout_p * out_item  # double-buffered output block
                     + 2 * Cin_p * in_item    # xi + rolled tap live values
                     + 2 * Cout_p * 4)        # f32 accumulator + pre-store
    if images_per_step is not None:
        nb = max(1, min(int(images_per_step), N))
    else:
        budget = int(vmem_cap * 0.45)
        nb = max(1, min(N, budget // max(per_img, 1)))
        if N >= 2:
            nb = min(nb, N // 2)             # keep >=2 grid steps (pipeline +
    while N % nb:                            # v7x megacore on "parallel" axis)
        nb -= 1
    vmem_limit = int(min(0.9 * vmem_cap, 112 << 20))

    kernel = functools.partial(_resblock_kernel, W=W)

    out = pl.pallas_call(
        kernel,
        out_shape=jax.ShapeDtypeStruct((N, Cout_p, HWp), x.dtype),
        grid_spec=pltpu.PrefetchScalarGridSpec(
            num_scalar_prefetch=0,
            grid=(N // nb,),
            in_specs=[
                pl.BlockSpec((nb, Cin_p, HWp), lambda n: (n, 0, 0)),
                pl.BlockSpec(w_taps.shape, lambda n: (0, 0, 0)),
                pl.BlockSpec(w_res.shape, lambda n: (0, 0)),
                pl.BlockSpec(b_main.shape, lambda n: (0, 0)),
                pl.BlockSpec(b_res.shape, lambda n: (0, 0)),
                pl.BlockSpec(mask.shape, lambda n: (0, 0, 0)),
            ],
            out_specs=pl.BlockSpec((nb, Cout_p, HWp), lambda n: (n, 0, 0)),
        ),
        compiler_params=pltpu.CompilerParams(
            dimension_semantics=("parallel",),
            vmem_limit_bytes=vmem_limit),
    )(x_flat, w_taps, w_res, b_main, b_res, mask)

    if (Cout_p, HWp) != (Cout, HW):
        out = out[:, :Cout, :HW]
    return out.reshape(N, Cout, H, W)


def residual_conv_block_reference(x, params, eps=1e-5):
    """Pure-JAX reference mirroring the PyTorch module (eval-mode BN)."""
    def bn(y, g, b, rm, rv):
        s = (g * lax.rsqrt(rv + eps)).reshape(1, -1, 1, 1)
        return (y - rm.reshape(1, -1, 1, 1)) * s + b.reshape(1, -1, 1, 1)

    dn = ("NCHW", "OIHW", "NCHW")
    Cout, Cin = params["w1"].shape

    main = lax.conv_general_dilated(x, params["w3"], (1, 1), [(1, 1), (1, 1)],
                                    dimension_numbers=dn)
    main = main + params["b3"].reshape(1, -1, 1, 1)
    main = jnp.maximum(bn(main, params["g1"], params["be1"],
                          params["rm1"], params["rv1"]), 0.0)

    res = lax.conv_general_dilated(x, params["w1"].reshape(Cout, Cin, 1, 1),
                                   (1, 1), "VALID", dimension_numbers=dn)
    res = res + params["b1"].reshape(1, -1, 1, 1)
    res = bn(res, params["g2"], params["be2"], params["rm2"], params["rv2"])
    return main + res


if __name__ == "__main__":
    key = jax.random.PRNGKey(0)
    N, Cin, Cout, H, W = 2, 4, 4, 16, 16
    ks = jax.random.split(key, 16)

    def rnd(k, shape, scale=0.1):
        return scale * jax.random.normal(k, shape, dtype=jnp.float32)

    params = dict(
        # main branch: 3x3 conv (bias) + BN1 + ReLU
        w3=rnd(ks[0], (Cout, Cin, 3, 3)),
        b3=rnd(ks[1], (Cout,)),
        g1=1.0 + rnd(ks[2], (Cout,)),
        be1=rnd(ks[3], (Cout,)),
        rm1=rnd(ks[4], (Cout,)),
        rv1=0.9 + jnp.abs(rnd(ks[5], (Cout,))),
        # residual branch: 1x1 conv (bias) + BN2 (no ReLU)
        w1=rnd(ks[6], (Cout, Cin)),
        b1=rnd(ks[7], (Cout,)),
        g2=1.0 + rnd(ks[8], (Cout,)),
        be2=rnd(ks[9], (Cout,)),
        rm2=rnd(ks[10], (Cout,)),
        rv2=0.9 + jnp.abs(rnd(ks[11], (Cout,))),
    )

    x = jax.random.normal(ks[12], (N, Cin, H, W), dtype=jnp.float32)

    out = residual_conv_block_forward(x, params)
    out = jax.block_until_ready(out)

    ref = residual_conv_block_reference(x, params)
    err = float(jnp.max(jnp.abs(out - ref)))
    assert out.shape == (N, Cout, H, W), out.shape
    assert err < 1e-3, f"max abs error {err}"

    print("KERNEL_OK")
</pallas_src>

<mosaic_0001>
module attributes {stable_mosaic.version = 11 : i64} {
  func.func @_resblock_kernel(%arg0: i32, %arg1: memref<1x8x256xf32, #tpu.memory_space<vmem>>, %arg2: memref<9x8x8xf32, #tpu.memory_space<vmem>>, %arg3: memref<8x8xf32, #tpu.memory_space<vmem>>, %arg4: memref<8x1xf32, #tpu.memory_space<vmem>>, %arg5: memref<8x1xf32, #tpu.memory_space<vmem>>, %arg6: memref<9x1x256xf32, #tpu.memory_space<vmem>>, %arg7: memref<1x8x256xf32, #tpu.memory_space<vmem>>) attributes {dimension_semantics = [#tpu.dimension_semantics<parallel>], iteration_bounds = array<i64: 2>, scalar_prefetch = 0 : i64, scratch_operands = 0 : i64, tpu.core_type = #tpu.core_type<tc>, window_params = [{transform_indices = @transform_0, window_bounds = array<i64: 1, 8, 256>}, {pipeline_mode = #tpu.pipeline_mode<synchronous>, transform_indices = @transform_1, window_bounds = array<i64: 9, 8, 8>}, {pipeline_mode = #tpu.pipeline_mode<synchronous>, transform_indices = @transform_2, window_bounds = array<i64: 8, 8>}, {pipeline_mode = #tpu.pipeline_mode<synchronous>, transform_indices = @transform_3, window_bounds = array<i64: 8, 1>}, {pipeline_mode = #tpu.pipeline_mode<synchronous>, transform_indices = @transform_4, window_bounds = array<i64: 8, 1>}, {pipeline_mode = #tpu.pipeline_mode<synchronous>, transform_indices = @transform_5, window_bounds = array<i64: 9, 1, 256>}, {transform_indices = @transform_6, window_bounds = array<i64: 1, 8, 256>}]} {
    %c0 = arith.constant 0 : index
    %c0_0 = arith.constant 0 : index
    %c0_1 = arith.constant 0 : index
    %0 = vector.load %arg2[%c0, %c0_0, %c0_1] : memref<9x8x8xf32, #tpu.memory_space<vmem>>, vector<1x8x8xf32>
    %1 = vector.shape_cast %0 : vector<1x8x8xf32> to vector<8x8xf32>
    %c1 = arith.constant 1 : index
    %c0_2 = arith.constant 0 : index
    %c0_3 = arith.constant 0 : index
    %2 = vector.load %arg2[%c1, %c0_2, %c0_3] : memref<9x8x8xf32, #tpu.memory_space<vmem>>, vector<1x8x8xf32>
    %3 = vector.shape_cast %2 : vector<1x8x8xf32> to vector<8x8xf32>
    %c2 = arith.constant 2 : index
    %c0_4 = arith.constant 0 : index
    %c0_5 = arith.constant 0 : index
    %4 = vector.load %arg2[%c2, %c0_4, %c0_5] : memref<9x8x8xf32, #tpu.memory_space<vmem>>, vector<1x8x8xf32>
    %5 = vector.shape_cast %4 : vector<1x8x8xf32> to vector<8x8xf32>
    %c3 = arith.constant 3 : index
    %c0_6 = arith.constant 0 : index
    %c0_7 = arith.constant 0 : index
    %6 = vector.load %arg2[%c3, %c0_6, %c0_7] : memref<9x8x8xf32, #tpu.memory_space<vmem>>, vector<1x8x8xf32>
    %7 = vector.shape_cast %6 : vector<1x8x8xf32> to vector<8x8xf32>
    %c4 = arith.constant 4 : index
    %c0_8 = arith.constant 0 : index
    %c0_9 = arith.constant 0 : index
    %8 = vector.load %arg2[%c4, %c0_8, %c0_9] : memref<9x8x8xf32, #tpu.memory_space<vmem>>, vector<1x8x8xf32>
    %9 = vector.shape_cast %8 : vector<1x8x8xf32> to vector<8x8xf32>
    %c5 = arith.constant 5 : index
    %c0_10 = arith.constant 0 : index
    %c0_11 = arith.constant 0 : index
    %10 = vector.load %arg2[%c5, %c0_10, %c0_11] : memref<9x8x8xf32, #tpu.memory_space<vmem>>, vector<1x8x8xf32>
    %11 = vector.shape_cast %10 : vector<1x8x8xf32> to vector<8x8xf32>
    %c6 = arith.constant 6 : index
    %c0_12 = arith.constant 0 : index
    %c0_13 = arith.constant 0 : index
    %12 = vector.load %arg2[%c6, %c0_12, %c0_13] : memref<9x8x8xf32, #tpu.memory_space<vmem>>, vector<1x8x8xf32>
    %13 = vector.shape_cast %12 : vector<1x8x8xf32> to vector<8x8xf32>
    %c7 = arith.constant 7 : index
    %c0_14 = arith.constant 0 : index
    %c0_15 = arith.constant 0 : index
    %14 = vector.load %arg2[%c7, %c0_14, %c0_15] : memref<9x8x8xf32, #tpu.memory_space<vmem>>, vector<1x8x8xf32>
    %15 = vector.shape_cast %14 : vector<1x8x8xf32> to vector<8x8xf32>
    %c8 = arith.constant 8 : index
    %c0_16 = arith.constant 0 : index
    %c0_17 = arith.constant 0 : index
    %16 = vector.load %arg2[%c8, %c0_16, %c0_17] : memref<9x8x8xf32, #tpu.memory_space<vmem>>, vector<1x8x8xf32>
    %17 = vector.shape_cast %16 : vector<1x8x8xf32> to vector<8x8xf32>
    %c0_18 = arith.constant 0 : index
    %c0_19 = arith.constant 0 : index
    %c0_20 = arith.constant 0 : index
    %18 = vector.load %arg6[%c0_18, %c0_19, %c0_20] : memref<9x1x256xf32, #tpu.memory_space<vmem>>, vector<1x1x256xf32>
    %19 = vector.shape_cast %18 : vector<1x1x256xf32> to vector<1x256xf32>
    %c1_21 = arith.constant 1 : index
    %c0_22 = arith.constant 0 : index
    %c0_23 = arith.constant 0 : index
    %20 = vector.load %arg6[%c1_21, %c0_22, %c0_23] : memref<9x1x256xf32, #tpu.memory_space<vmem>>, vector<1x1x256xf32>
    %21 = vector.shape_cast %20 : vector<1x1x256xf32> to vector<1x256xf32>
    %c2_24 = arith.constant 2 : index
    %c0_25 = arith.constant 0 : index
    %c0_26 = arith.constant 0 : index
    %22 = vector.load %arg6[%c2_24, %c0_25, %c0_26] : memref<9x1x256xf32, #tpu.memory_space<vmem>>, vector<1x1x256xf32>
    %23 = vector.shape_cast %22 : vector<1x1x256xf32> to vector<1x256xf32>
    %c3_27 = arith.constant 3 : index
    %c0_28 = arith.constant 0 : index
    %c0_29 = arith.constant 0 : index
    %24 = vector.load %arg6[%c3_27, %c0_28, %c0_29] : memref<9x1x256xf32, #tpu.memory_space<vmem>>, vector<1x1x256xf32>
    %25 = vector.shape_cast %24 : vector<1x1x256xf32> to vector<1x256xf32>
    %c5_30 = arith.constant 5 : index
    %c0_31 = arith.constant 0 : index
    %c0_32 = arith.constant 0 : index
    %26 = vector.load %arg6[%c5_30, %c0_31, %c0_32] : memref<9x1x256xf32, #tpu.memory_space<vmem>>, vector<1x1x256xf32>
    %27 = vector.shape_cast %26 : vector<1x1x256xf32> to vector<1x256xf32>
    %c6_33 = arith.constant 6 : index
    %c0_34 = arith.constant 0 : index
    %c0_35 = arith.constant 0 : index
    %28 = vector.load %arg6[%c6_33, %c0_34, %c0_35] : memref<9x1x256xf32, #tpu.memory_space<vmem>>, vector<1x1x256xf32>
    %29 = vector.shape_cast %28 : vector<1x1x256xf32> to vector<1x256xf32>
    %c7_36 = arith.constant 7 : index
    %c0_37 = arith.constant 0 : index
    %c0_38 = arith.constant 0 : index
    %30 = vector.load %arg6[%c7_36, %c0_37, %c0_38] : memref<9x1x256xf32, #tpu.memory_space<vmem>>, vector<1x1x256xf32>
    %31 = vector.shape_cast %30 : vector<1x1x256xf32> to vector<1x256xf32>
    %c8_39 = arith.constant 8 : index
    %c0_40 = arith.constant 0 : index
    %c0_41 = arith.constant 0 : index
    %32 = vector.load %arg6[%c8_39, %c0_40, %c0_41] : memref<9x1x256xf32, #tpu.memory_space<vmem>>, vector<1x1x256xf32>
    %33 = vector.shape_cast %32 : vector<1x1x256xf32> to vector<1x256xf32>
    %c0_42 = arith.constant 0 : index
    %c0_43 = arith.constant 0 : index
    %34 = vector.load %arg3[%c0_42, %c0_43] : memref<8x8xf32, #tpu.memory_space<vmem>>, vector<8x8xf32>
    %c0_44 = arith.constant 0 : index
    %c0_45 = arith.constant 0 : index
    %35 = vector.load %arg4[%c0_44, %c0_45] : memref<8x1xf32, #tpu.memory_space<vmem>>, vector<8x1xf32>
    %c0_46 = arith.constant 0 : index
    %c0_47 = arith.constant 0 : index
    %36 = vector.load %arg5[%c0_46, %c0_47] : memref<8x1xf32, #tpu.memory_space<vmem>>, vector<8x1xf32>
    %c0_48 = arith.constant 0 : index
    %c0_49 = arith.constant 0 : index
    %c0_50 = arith.constant 0 : index
    %37 = vector.load %arg1[%c0_48, %c0_49, %c0_50] : memref<1x8x256xf32, #tpu.memory_space<vmem>>, vector<1x8x256xf32>
    %38 = vector.shape_cast %37 : vector<1x8x256xf32> to vector<8x256xf32>
    %cst = arith.constant 0.000000e+00 : f32
    %39 = vector.broadcast %cst : f32 to vector<8x256xf32>
    %c17_i32 = arith.constant 17 : i32
    %40 = tpu.dynamic_rotate %38 by %c17_i32 dim 1 : vector<8x256xf32>, i32 -> vector<8x256xf32>
    %41 = vector.broadcast %19 : vector<1x256xf32> to vector<8x256xf32>
    %42 = arith.mulf %40, %41 : vector<8x256xf32>
    %cst_51 = arith.constant dense<0.000000e+00> : vector<8x256xf32>
    %43 = tpu.matmul %1, %42, %cst_51 {dimension_numbers = #tpu.dot_dimension_numbers<[1], [0], [0], [1], [0, 0, 1, 1], [], []>} : vector<8x8xf32>, vector<8x256xf32>, vector<8x256xf32> -> vector<8x256xf32>
    %44 = arith.addf %39, %43 : vector<8x256xf32>
    %c16_i32 = arith.constant 16 : i32
    %45 = tpu.dynamic_rotate %38 by %c16_i32 dim 1 : vector<8x256xf32>, i32 -> vector<8x256xf32>
    %46 = vector.broadcast %21 : vector<1x256xf32> to vector<8x256xf32>
    %47 = arith.mulf %45, %46 : vector<8x256xf32>
    %cst_52 = arith.constant dense<0.000000e+00> : vector<8x256xf32>
    %48 = tpu.matmul %3, %47, %cst_52 {dimension_numbers = #tpu.dot_dimension_numbers<[1], [0], [0], [1], [0, 0, 1, 1], [], []>} : vector<8x8xf32>, vector<8x256xf32>, vector<8x256xf32> -> vector<8x256xf32>
    %49 = arith.addf %44, %48 : vector<8x256xf32>
    %c15_i32 = arith.constant 15 : i32
    %50 = tpu.dynamic_rotate %38 by %c15_i32 dim 1 : vector<8x256xf32>, i32 -> vector<8x256xf32>
    %51 = vector.broadcast %23 : vector<1x256xf32> to vector<8x256xf32>
    %52 = arith.mulf %50, %51 : vector<8x256xf32>
    %cst_53 = arith.constant dense<0.000000e+00> : vector<8x256xf32>
    %53 = tpu.matmul %5, %52, %cst_53 {dimension_numbers = #tpu.dot_dimension_numbers<[1], [0], [0], [1], [0, 0, 1, 1], [], []>} : vector<8x8xf32>, vector<8x256xf32>, vector<8x256xf32> -> vector<8x256xf32>
    %54 = arith.addf %49, %53 : vector<8x256xf32>
    %c1_i32 = arith.constant 1 : i32
    %55 = tpu.dynamic_rotate %38 by %c1_i32 dim 1 : vector<8x256xf32>, i32 -> vector<8x256xf32>
    %56 = vector.broadcast %25 : vector<1x256xf32> to vector<8x256xf32>
    %57 = arith.mulf %55, %56 : vector<8x256xf32>
    %cst_54 = arith.constant dense<0.000000e+00> : vector<8x256xf32>
    %58 = tpu.matmul %7, %57, %cst_54 {dimension_numbers = #tpu.dot_dimension_numbers<[1], [0], [0], [1], [0, 0, 1, 1], [], []>} : vector<8x8xf32>, vector<8x256xf32>, vector<8x256xf32> -> vector<8x256xf32>
    %59 = arith.addf %54, %58 : vector<8x256xf32>
    %cst_55 = arith.constant dense<0.000000e+00> : vector<8x256xf32>
    %60 = tpu.matmul %9, %38, %cst_55 {dimension_numbers = #tpu.dot_dimension_numbers<[1], [0], [0], [1], [0, 0, 1, 1], [], []>} : vector<8x8xf32>, vector<8x256xf32>, vector<8x256xf32> -> vector<8x256xf32>
    %61 = arith.addf %59, %60 : vector<8x256xf32>
    %c255_i32 = arith.constant 255 : i32
    %62 = tpu.dynamic_rotate %38 by %c255_i32 dim 1 : vector<8x256xf32>, i32 -> vector<8x256xf32>
    %63 = vector.broadcast %27 : vector<1x256xf32> to vector<8x256xf32>
    %64 = arith.mulf %62, %63 : vector<8x256xf32>
    %cst_56 = arith.constant dense<0.000000e+00> : vector<8x256xf32>
    %65 = tpu.matmul %11, %64, %cst_56 {dimension_numbers = #tpu.dot_dimension_numbers<[1], [0], [0], [1], [0, 0, 1, 1], [], []>} : vector<8x8xf32>, vector<8x256xf32>, vector<8x256xf32> -> vector<8x256xf32>
    %66 = arith.addf %61, %65 : vector<8x256xf32>
    %c241_i32 = arith.constant 241 : i32
    %67 = tpu.dynamic_rotate %38 by %c241_i32 dim 1 : vector<8x256xf32>, i32 -> vector<8x256xf32>
    %68 = vector.broadcast %29 : vector<1x256xf32> to vector<8x256xf32>
    %69 = arith.mulf %67, %68 : vector<8x256xf32>
    %cst_57 = arith.constant dense<0.000000e+00> : vector<8x256xf32>
    %70 = tpu.matmul %13, %69, %cst_57 {dimension_numbers = #tpu.dot_dimension_numbers<[1], [0], [0], [1], [0, 0, 1, 1], [], []>} : vector<8x8xf32>, vector<8x256xf32>, vector<8x256xf32> -> vector<8x256xf32>
    %71 = arith.addf %66, %70 : vector<8x256xf32>
    %c240_i32 = arith.constant 240 : i32
    %72 = tpu.dynamic_rotate %38 by %c240_i32 dim 1 : vector<8x256xf32>, i32 -> vector<8x256xf32>
    %73 = vector.broadcast %31 : vector<1x256xf32> to vector<8x256xf32>
    %74 = arith.mulf %72, %73 : vector<8x256xf32>
    %cst_58 = arith.constant dense<0.000000e+00> : vector<8x256xf32>
    %75 = tpu.matmul %15, %74, %cst_58 {dimension_numbers = #tpu.dot_dimension_numbers<[1], [0], [0], [1], [0, 0, 1, 1], [], []>} : vector<8x8xf32>, vector<8x256xf32>, vector<8x256xf32> -> vector<8x256xf32>
    %76 = arith.addf %71, %75 : vector<8x256xf32>
    %c239_i32 = arith.constant 239 : i32
    %77 = tpu.dynamic_rotate %38 by %c239_i32 dim 1 : vector<8x256xf32>, i32 -> vector<8x256xf32>
    %78 = vector.broadcast %33 : vector<1x256xf32> to vector<8x256xf32>
    %79 = arith.mulf %77, %78 : vector<8x256xf32>
    %cst_59 = arith.constant dense<0.000000e+00> : vector<8x256xf32>
    %80 = tpu.matmul %17, %79, %cst_59 {dimension_numbers = #tpu.dot_dimension_numbers<[1], [0], [0], [1], [0, 0, 1, 1], [], []>} : vector<8x8xf32>, vector<8x256xf32>, vector<8x256xf32> -> vector<8x256xf32>
    %81 = arith.addf %76, %80 : vector<8x256xf32>
    %cst_60 = arith.constant dense<0.000000e+00> : vector<8x256xf32>
    %82 = tpu.matmul %34, %38, %cst_60 {dimension_numbers = #tpu.dot_dimension_numbers<[1], [0], [0], [1], [0, 0, 1, 1], [], []>} : vector<8x8xf32>, vector<8x256xf32>, vector<8x256xf32> -> vector<8x256xf32>
    %83 = vector.broadcast %36 : vector<8x1xf32> to vector<8x256xf32>
    %84 = arith.addf %82, %83 : vector<8x256xf32>
    %85 = vector.broadcast %35 : vector<8x1xf32> to vector<8x256xf32>
    %86 = arith.addf %81, %85 : vector<8x256xf32>
    %cst_61 = arith.constant 0.000000e+00 : f32
    %87 = vector.broadcast %cst_61 : f32 to vector<8x256xf32>
    %88 = arith.maximumf %86, %87 : vector<8x256xf32>
    %89 = arith.addf %88, %84 : vector<8x256xf32>
    %c0_62 = arith.constant 0 : index
    %c0_63 = arith.constant 0 : index
    %c0_64 = arith.constant 0 : index
    %90 = vector.load %arg7[%c0_62, %c0_63, %c0_64] : memref<1x8x256xf32, #tpu.memory_space<vmem>>, vector<1x8x256xf32>
    %91 = vector.shape_cast %90 : vector<1x8x256xf32> to vector<8x256xf32>
    %92 = vector.shape_cast %89 : vector<8x256xf32> to vector<1x8x256xf32>
    tpu.vector_store %arg7[%c0_62, %c0_63, %c0_64], %92 {strides = array<i32>} : memref<1x8x256xf32, #tpu.memory_space<vmem>>, vector<1x8x256xf32>,
    return
  }
  func.func @transform_0(%arg0: i32) -> (i32, i32, i32) {
    %c0_i32 = arith.constant 0 : i32
    %c0_i32_0 = arith.constant 0 : i32
    %c0_i32_1 = arith.constant 0 : i32
    return %arg0, %c0_i32, %c0_i32_0 : i32, i32, i32
  }
  func.func @transform_1(%arg0: i32) -> (i32, i32, i32) {
    %c0_i32 = arith.constant 0 : i32
    %c0_i32_0 = arith.constant 0 : i32
    %c0_i32_1 = arith.constant 0 : i32
    %c0_i32_2 = arith.constant 0 : i32
    return %c0_i32, %c0_i32_0, %c0_i32_1 : i32, i32, i32
  }
  func.func @transform_2(%arg0: i32) -> (i32, i32) {
    %c0_i32 = arith.constant 0 : i32
    %c0_i32_0 = arith.constant 0 : i32
    %c0_i32_1 = arith.constant 0 : i32
    return %c0_i32, %c0_i32_0 : i32, i32
  }
  func.func @transform_3(%arg0: i32) -> (i32, i32) {
    %c0_i32 = arith.constant 0 : i32
    %c0_i32_0 = arith.constant 0 : i32
    %c0_i32_1 = arith.constant 0 : i32
    return %c0_i32, %c0_i32_0 : i32, i32
  }
  func.func @transform_4(%arg0: i32) -> (i32, i32) {
    %c0_i32 = arith.constant 0 : i32
    %c0_i32_0 = arith.constant 0 : i32
    %c0_i32_1 = arith.constant 0 : i32
    return %c0_i32, %c0_i32_0 : i32, i32
  }
  func.func @transform_5(%arg0: i32) -> (i32, i32, i32) {
    %c0_i32 = arith.constant 0 : i32
    %c0_i32_0 = arith.constant 0 : i32
    %c0_i32_1 = arith.constant 0 : i32
    %c0_i32_2 = arith.constant 0 : i32
    return %c0_i32, %c0_i32_0, %c0_i32_1 : i32, i32, i32
  }
  func.func @transform_6(%arg0: i32) -> (i32, i32, i32) {
    %c0_i32 = arith.constant 0 : i32
    %c0_i32_0 = arith.constant 0 : i32
    %c0_i32_1 = arith.constant 0 : i32
    return %arg0, %c0_i32, %c0_i32_0 : i32, i32, i32
  }
}

</mosaic_0001>

<bundles_post_ra>
// kernel: tpu_custom_call.1
= control target key start
LH: loop header
LB: loop body
LE: loop exit
PB: predicated region body
PF: predicated region fallthrough
CT: control target
= control target key end

     0   :  { %11 = vsyncpa [#allocation3], 0  ;;  %s1750_s0 = inlined_call_operand.vmem [shape: f32[2,8,256], index: 0, kind: input, shape index: {}]   ;;  %s1751_s1 = inlined_call_operand.vmem [shape: f32[9,8,8], index: 1, kind: input, shape index: {}]   ;;  %s1752_s2 = inlined_call_operand.vmem [shape: f32[8,8], index: 2, kind: input, shape index: {}]   ;;  %s1753_s3 = inlined_call_operand.vmem [shape: f32[8,1], index: 3, kind: input, shape index: {}]   ;;  %s1754_s4 = inlined_call_operand.vmem [shape: f32[8,1], index: 4, kind: input, shape index: {}]   ;;  %s1755_s5 = inlined_call_operand.vmem [shape: f32[9,1,256], index: 5, kind: input, shape index: {}]   ;;  %s1756_s6 = inlined_call_operand.hbm [shape: f32[2,8,256], index: 6, kind: output, shape index: {}]  }
   0x1   :  { %13 = vsyncpa [#allocation3 + $0x1], 0  ;;  %s1512_s21 = smov 0   ;;  %s1514_s22 = smov 0  }
   0x2   :  { %s1516_s23 = smov 0   ;;  %s1518_s24 = smov 0  }
   0x3 LB: > { %s1533_s25 = sadd.s32 4294967295, %s1464_s24   ;;  %s1296_s26 = sadd.s32 4294967294, %s1464_s24   ;;  %s1464_s24 = sphi %s1518_s24, %s1762_s24   ;;  %s1460_s23 = sphi %s1516_s23, %s1761_s23   ;;  %s1456_s22 = sphi %s1514_s22, %s1760_s22   ;;  %s1452_s21 = sphi %s1512_s21, %s1759_s21  }
   0x4   : > { %s1537_s27 = sadd.s32 1, %s1464_s24   ;;  %s157_s28 = sadd.s32 1, %s1460_s23 }
   0x5   : > { %s154_s29 = ssub.s32 %s1464_s24, %s1537_s27  ;;  %p167_p0 = scmp.ne.s32.totalorder %s1460_s23, %s1456_s22 }
   0x6   : > { %p155_p1 = scmp.eq.s32.totalorder %s154_s29, 0  ;;  %p168_p2 = scmp.eq.s32.totalorder %s1533_s25, 1 }
   0x7   : > { %p173_p3 = scmp.ne.s32.totalorder %s1456_s22, %s1452_s21  ;;  %p174_p4 = scmp.eq.s32.totalorder %s1296_s26, 1 }
   0x8   : > { %s1548_s30 = scalar_select %p155_p1, %s1460_s23, %s157_s28  }
   0x9   : > { %p1550_p5 = por %p168_p2, %p167_p0  ;;  %p1554_p6 = por %p174_p4, %p173_p3 }
   0xa   : > { %p1299_p7 = scmp.ge.s32.totalorder %s1464_s24, 1  ;;  %p215_p8 = scmp.lt.s32.totalorder %s1464_s24, 3 }
   0xc   : > { %p216_p9 = pnand %p1299_p7, %p215_p8 }
   0xd   : > { %p245_p10 = scmp.lt.s32.totalorder (!%p216_p9), %s1533_s25, 1  ;;  %v1466_v0 = vmov (!%p216_p9), 0.0   ;;  %s1467_s14 = smov (!%p216_p9), 127   ;;  %v1306_v3 = vld [vmem:[%s1751_s1 + $0x20] sm:$0xff] (!%p216_p9)  ;;  %vm329_vm0 = vcmask (!%p216_p9), 64512   ;;  %v1474_v4 = vmov (!%p216_p9), 0   ;;  %v291_v7 = vlaneseq (!%p216_p9) }
   0xe   : > { %219 = sbr.rel (%p216_p9) target bundleno = 409 (0x199), region = 44  ;;  %737 = vmatprep.mubr.f32.mxu0 (!%p216_p9), %v1466_v0  ;;  %397 = vmatprep.mubr.f32.mxu1 (!%p216_p9), %v1466_v0  ;;  %s1468_s15 = smov (!%p216_p9), 16   ;;  %v283_v5 = vld [vmem:[%s1753_s3] sm:$0xff] (!%p216_p9)  ;;  %v1314_v12 = vld [vmem:[%s1755_s5 + $0xa] sm:$0x3] (!%p216_p9)  ;;  %v1308_v55 = vld [vmem:[%s1751_s1 + $0x30] sm:$0xff] (!%p216_p9) }
   0xf   : > { %s1469_s18 = smov (!%p216_p9), 17   ;;  %s1470_s19 = smov (!%p216_p9), 113   ;;  %1400 = vset.pattern.permute.xlu0 (!%p216_p9), %v1474_v4  ;;  %1401 = vset.pattern.permute.xlu1 (!%p216_p9), %v1474_v4  ;;  %v284_v6 = vld [vmem:[%s1754_s4] sm:$0xff] (!%p216_p9)  ;;  %v298_v8 = vshrl.u32 (!%p216_p9), %v291_v7, 7  ;;  %v1600_v9 = vand.u32 (!%p216_p9), 127, %v291_v7  ;;  %v1303_v34 = vld [vmem:[%s1751_s1 + $0x8] sm:$0xff] (!%p216_p9) }
  0x10   : > { %s1471_s20 = smov (!%p216_p9), 15   ;;  %s1472_s26 = smov (!%p216_p9), 112   ;;  %v1311_v13 = vld [vmem:[%s1755_s5 + $0x2] sm:$0x3] (!%p216_p9)  ;;  %v267_v16 = vld [vmem:[%s1755_s5] sm:$0x3] (!%p216_p9) }
  0x11   : > { %s1473_s28 = smov (!%p216_p9), 1   ;;  %s1475_s29 = smov (!%p216_p9), 111   ;;  %v1602_v10 = vsub.s32 (!%p216_p9), 0, %v298_v8  ;;  %v1604_v11 = vsub.s32 (!%p216_p9), 1, %v298_v8  ;;  %vm750_vm1 = vcmp.lt.s32.totalorder (!%p216_p9), %v1600_v9, 127  ;;  %vm313_vm2 = vcmp.lt.s32.totalorder (!%p216_p9), %v1600_v9, 16 }
  0x12   : > { %vm293_vm3 = vcmp.lt.s32.totalorder (!%p216_p9), %v1600_v9, 17  ;;  %v1315_v33 = vld [vmem:[%s1755_s5 + $0xc] sm:$0x3] (!%p216_p9)  ;;  %vm846_vm4 = vcmp.lt.s32.totalorder (!%p216_p9), %v1600_v9, 113  ;;  %v1312_v44 = vld [vmem:[%s1755_s5 + $0x4] sm:$0x3] (!%p216_p9) }
  0x13   : > { %v757_v17 = vrot.slane (!%p216_p9), %v1314_v12, %v1602_v10  ;;  %v761_v18 = vrot.slane (!%p216_p9), %v1314_v12, %v1604_v11  ;;  %v324_v19 = vrot.slane (!%p216_p9), %v1311_v13, %v1604_v11  ;;  %v320_v20 = vrot.slane (!%p216_p9), %v1311_v13, %v1602_v10  ;;  %v1307_v35 = vld [vmem:[%s1751_s1 + $0x28] sm:$0xff] (!%p216_p9)  ;;  %v250_v54 = vld [vmem:[%s1751_s1] sm:$0xff] (!%p216_p9)  ;;  %s242_s17 = sand.u32 (!%p216_p9), 1, %s1456_s22   ;;  %s1476_s11 = smov (!%p216_p9), [#allocation2]  }
  0x14   : > { %v300_v23 = vrot.slane (!%p216_p9), %v267_v16, %v1602_v10  ;;  %v304_v24 = vrot.slane (!%p216_p9), %v267_v16, %v1604_v11  ;;  %v853_v40 = vrot.slane (!%p216_p9), %v1315_v33, %v1602_v10  ;;  %v857_v43 = vrot.slane (!%p216_p9), %v1315_v33, %v1604_v11  ;;  %v1316_v53 = vld [vmem:[%s1755_s5 + $0xe] sm:$0x3] (!%p216_p9)  ;;  %v1304_v16 = vld [vmem:[%s1751_s1 + $0x10] sm:$0xff] (!%p216_p9)  ;;  %s1406_s12 = sshll.u32 (!%p216_p9), %s1476_s11, 4  ;;  %s1407_s12 = int_to_ptr.vmem [resolvable:$false] %s1406_s12 }
  0x15   : > { %s246_s9 = scalar_select %p245_p10, %s1533_s25, 1  ;;  %vm482_vm5 = vcmp.lt.s32.totalorder %v1600_v9, 15  ;;  %v489_v51 = vrot.slane %v1312_v44, %v1602_v10  ;;  %v493_v52 = vrot.slane %v1312_v44, %v1604_v11  ;;  %v949_v60 = vrot.slane %v1316_v53, %v1602_v10 }
  0x16   : > { %vm942_vm6 = vcmp.lt.s32.totalorder %v1600_v9, 112  ;;  %v953_v63 = vrot.slane %v1316_v53, %v1604_v11  ;;  %vm578_vm7 = vcmp.lt.s32.totalorder %v1600_v9, 1  ;;  %vm1038_vm8 = vcmp.lt.s32.totalorder %v1600_v9, 111  ;;  %v1305_v9 = vld [vmem:[%s1751_s1 + $0x18] sm:$0xff] }
  0x17   : > { %s1333_s10 = sshll.u32 %s246_s9, 4 }
  0x18   : > { %s249_s13 = scalar_lea.vmem %s1750_s0, %s1333_s10  ;;  %s1223_s10 = scalar_lea.sflag [#allocation3], %s242_s17 }
  0x19   : > { %v1567_v1 = vld [vmem:[%s249_s13] sm:$0xff]  ;;  %v1571_v2 = vld [vmem:[%s249_s13 + $0x8] sm:$0xff]  ;;  %s1408_s13 = scalar_lea.vmem %s1407_s12, 512 }
  0x1a   : > { %746 = vrot.lane.b32.xlu1 %v1567_v1, %s1467_s14  ;;  %309 = vrot.lane.b32.xlu0 %v1567_v1, %s1468_s15 }
  0x1b   : > { %673 = vmatprep.subr.mxu0 %v1571_v2 }
  0x1c   : > { %674 = vmatpush1.msra.mxu0 %v1567_v1 }
  0x1d   : > { %1322 = vmatmul.mubr.msk.f32.vlgmr.msra.gmra.mrb[0].mxu0 %vm329_vm0, %v1306_v3  ;;  %v1313_v3 = vld [vmem:[%s1755_s5 + $0x6] sm:$0x3] }
  0x1e   : > { %748 = vrot.lane.b32.xlu1 %v1571_v2, %s1467_s14  ;;  %311 = vrot.lane.b32.xlu0 %v1571_v2, %s1468_s15  ;;  %v585_v13 = vrot.slane %v1313_v3, %v1602_v10 }
  0x1f   : > { %833 = vmatprep.mubr.f32.mxu0 %v1466_v0 }
  0x22   : > { %289 = vrot.lane.b32.xlu1 %v1571_v2, %s1469_s18  ;;  %287 = vrot.lane.b32.xlu0 %v1567_v1, %s1469_s18  ;;  %s1300_s18 = sshll.u32 %s242_s17, 4 }
  0x26   : > { %844 = vrot.lane.b32.xlu1 %v1571_v2, %s1470_s19  ;;  %842 = vrot.lane.b32.xlu0 %v1567_v1, %s1470_s19  ;;  %s1334_s19 = sshll.u32 %s1533_s25, 8 }
  0x27   : > { %s1708_s9 = scalar_lea.hbm %s1756_s6, %s1334_s19 }
  0x2a   : > { %480 = vrot.lane.b32.xlu1 %v1571_v2, %s1471_s20  ;;  %478 = vrot.lane.b32.xlu0 %v1567_v1, %s1471_s20  ;;  %s244_s20 = scalar_lea.vmem [#allocation2], %s1300_s18 }
  0x2e   : > { %940 = vrot.lane.b32.xlu1 %v1571_v2, %s1472_s26  ;;  %938 = vrot.lane.b32.xlu0 %v1567_v1, %s1472_s26  ;;  %s1237_s26 = sshll.u32 %s244_s20, 4  ;;  %s1710_s26 = int_to_ptr.vmem [resolvable:$true] %s1237_s26 }
  0x2f   : > { %s1402_s25 = scalar_lea.vmem %s1710_s26, 256  ;;  %p1409_p0 = scmp.lt.s32.totalorder %s1710_s26, %s1407_s12 }
  0x30   : > { %p1403_p11 = scmp.ne.s32.totalorder %s1710_s26, %s1402_s25  ;;  %p1410_p1 = scmp.lt.s32.totalorder %s1408_s13, %s1402_s25 }
  0x32   : > { %576 = vrot.lane.b32.xlu1 %v1571_v2, %s1473_s28  ;;  %574 = vrot.lane.b32.xlu0 %v1567_v1, %s1473_s28  ;;  %p1404_p12 = pnand %p1403_p11, %p1550_p5  ;;  %p1411_p2 = por %p1410_p1, %p1409_p0 }
  0x34   : > { %p1405_p13 = pneg %p1404_p12 }
  0x36   : > { %1036 = vrot.lane.b32.xlu1 %v1571_v2, %s1475_s29  ;;  %1034 = vrot.lane.b32.xlu0 %v1567_v1, %s1475_s29  ;;  %p1412_p3 = pnand %p1411_p2, %p1405_p13 }
  0x3a   : > { %1211 = vperm.xlu0 %1400, %v283_v5   ;;  %1132 = vperm.xlu1 %1401, %v284_v6  }
  0x8c   : > { %v747_v14 = vpop.permute.xlu1 %746  ;;  %v310_v15 = vpop.permute.xlu0 %309 }
  0x90   : > { %v749_v21 = vpop.permute.xlu1 %748  ;;  %v312_v22 = vpop.permute.xlu0 %311 }
  0x91   : > { %v751_v25 = vsel %vm750_vm1, %v747_v14, %v749_v21  ;;  %v752_v26 = vsel %vm750_vm1, %v749_v21, %v747_v14  ;;  %v315_v27 = vsel %vm313_vm2, %v312_v22, %v310_v15  ;;  %v314_v28 = vsel %vm313_vm2, %v310_v15, %v312_v22  ;;  %v1317_v15 = vld [vmem:[%s1755_s5 + $0x10] sm:$0x3] }
  0x92   : > { %v764_v29 = vmul.f32 %v757_v17, %v751_v25  ;;  %v765_v30 = vmul.f32 %v761_v18, %v752_v26  ;;  %v328_v31 = vmul.f32 %v324_v19, %v314_v28  ;;  %v327_v32 = vmul.f32 %v320_v20, %v315_v27  ;;  %v1309_v17 = vld [vmem:[%s1751_s1 + $0x38] sm:$0xff] }
  0x93   : > { %v589_v14 = vrot.slane %v1313_v3, %v1604_v11  ;;  %v1045_v22 = vrot.slane %v1317_v15, %v1602_v10  ;;  %v1049_v25 = vrot.slane %v1317_v15, %v1604_v11  ;;  %v1310_v11 = vld [vmem:[%s1751_s1 + $0x40] sm:$0xff] }
  0x94   : > { %v290_v36 = vpop.permute.xlu1 %289  ;;  %333 = vmatprep.subr.mxu1 %v328_v31  ;;  %v288_v37 = vpop.permute.xlu0 %287  ;;  %769 = vmatprep.subr.mxu0 %v765_v30 }
  0x95   : > { %v294_v38 = vsel %vm293_vm3, %v288_v37, %v290_v36  ;;  %v295_v39 = vsel %vm293_vm3, %v290_v36, %v288_v37  ;;  %334 = vmatpush1.msra.mxu1 %v327_v32  ;;  %770 = vmatpush1.msra.mxu0 %v764_v29 }
  0x96   : > { %v307_v41 = vmul.f32 %v300_v23, %v295_v39  ;;  %v308_v42 = vmul.f32 %v304_v24, %v294_v38  ;;  %1318 = vmatmul.mubr.msk.f32.vlgmr.msra.gmra.mrb[0].mxu1 %vm329_vm0, %v1303_v34  ;;  %1323 = vmatmul.mubr.msk.f32.vlgmr.msra.gmra.mrb[0].mxu0 %vm329_vm0, %v1307_v35 }
  0x97   : > { %471 = vmatprep.mubr.f32.mxu1 %v1466_v0  ;;  %929 = vmatprep.mubr.f32.mxu0 %v1466_v0 }
  0x98   : > { %v845_v45 = vpop.permute.xlu1 %844  ;;  %407 = vmatprep.subr.mxu1 %v308_v42  ;;  %v843_v46 = vpop.permute.xlu0 %842 }
  0x99   : > { %v847_v47 = vsel %vm846_vm4, %v843_v46, %v845_v45  ;;  %v848_v48 = vsel %vm846_vm4, %v845_v45, %v843_v46  ;;  %408 = vmatpush1.msra.mxu1 %v307_v41 }
  0x9a   : > { %v860_v49 = vmul.f32 %v853_v40, %v847_v47  ;;  %v861_v50 = vmul.f32 %v857_v43, %v848_v48 }
  0x9c   : > { %v481_v56 = vpop.permute.xlu1 %480  ;;  %v479_v57 = vpop.permute.xlu0 %478  ;;  %865 = vmatprep.subr.mxu0 %v861_v50 }
  0x9d   : > { %v483_v58 = vsel %vm482_vm5, %v479_v57, %v481_v56  ;;  %v484_v59 = vsel %vm482_vm5, %v481_v56, %v479_v57  ;;  %866 = vmatpush1.msra.mxu0 %v860_v49 }
  0x9e   : > { %v496_v61 = vmul.f32 %v489_v51, %v484_v59  ;;  %v497_v62 = vmul.f32 %v493_v52, %v483_v58  ;;  %1319 = vmatmul.mubr.msk.f32.vlgmr.msra.gmra.mrb[0].mxu1 %vm329_vm0, %v250_v54  ;;  %1324 = vmatmul.mubr.msk.f32.vlgmr.msra.gmra.mrb[0].mxu0 %vm329_vm0, %v1308_v55 }
  0x9f   : > { %565 = vmatprep.mubr.f32.mxu1 %v1466_v0  ;;  %1025 = vmatprep.mubr.f32.mxu0 %v1466_v0 }
  0xa0   : > { %v941_v4 = vpop.permute.xlu1 %940  ;;  %501 = vmatprep.subr.mxu1 %v497_v62  ;;  %v939_v5 = vpop.permute.xlu0 %938 }
  0xa1   : > { %v943_v6 = vsel %vm942_vm6, %v939_v5, %v941_v4  ;;  %v944_v7 = vsel %vm942_vm6, %v941_v4, %v939_v5  ;;  %502 = vmatpush1.msra.mxu1 %v496_v61 }
  0xa2   : > { %v956_v8 = vmul.f32 %v949_v60, %v943_v6  ;;  %v957_v12 = vmul.f32 %v953_v63, %v944_v7 }
  0xa4   : > { %v577_v18 = vpop.permute.xlu1 %576  ;;  %v575_v19 = vpop.permute.xlu0 %574  ;;  %961 = vmatprep.subr.mxu0 %v957_v12 }
  0xa5   : > { %v579_v20 = vsel %vm578_vm7, %v575_v19, %v577_v18  ;;  %v580_v21 = vsel %vm578_vm7, %v577_v18, %v575_v19  ;;  %962 = vmatpush1.msra.mxu0 %v956_v8 }
  0xa6   : > { %v592_v23 = vmul.f32 %v585_v13, %v580_v21  ;;  %v593_v24 = vmul.f32 %v589_v14, %v579_v20  ;;  %1320 = vmatmul.mubr.msk.f32.vlgmr.msra.gmra.mrb[0].mxu1 %vm329_vm0, %v1304_v16  ;;  %1325 = vmatmul.mubr.msk.f32.vlgmr.msra.gmra.mrb[0].mxu0 %vm329_vm0, %v1309_v17 }
  0xa7   : > { %661 = vmatprep.mubr.f32.mxu1 %v1466_v0  ;;  %1121 = vmatprep.mubr.f32.mxu0 %v1466_v0 }
  0xa8   : > { %v1037_v26 = vpop.permute.xlu1 %1036  ;;  %597 = vmatprep.subr.mxu1 %v593_v24  ;;  %v1035_v27 = vpop.permute.xlu0 %1034 }
  0xa9   : > { %v1039_v28 = vsel %vm1038_vm8, %v1035_v27, %v1037_v26  ;;  %v1040_v10 = vsel %vm1038_vm8, %v1037_v26, %v1035_v27  ;;  %598 = vmatpush1.msra.mxu1 %v592_v23 }
  0xaa   : > { %v1052_v29 = vmul.f32 %v1045_v22, %v1039_v28  ;;  %v1053_v30 = vmul.f32 %v1049_v25, %v1040_v10  ;;  %1138 = vmatprep.subr.mxu1 %v1571_v2  ;;  %v282_v2 = vld [vmem:[%s1752_s2] sm:$0xff] }
  0xac   : > { %1057 = vmatprep.subr.mxu0 %v1053_v30 }
  0xad   : > { %1058 = vmatpush1.msra.mxu0 %v1052_v29 }
  0xae   : > { %1321 = vmatmul.mubr.msk.f32.vlgmr.msra.gmra.mrb[0].mxu1 %vm329_vm0, %v1305_v9  ;;  %1326 = vmatmul.mubr.msk.f32.vlgmr.msra.gmra.mrb[0].mxu0 %vm329_vm0, %v1310_v11 }
  0xaf   : > { %1139 = vmatpush1.msra.mxu1 %v1567_v1  ;;  %1202 = vmatprep.mubr.f32.mxu1 %v1466_v0 }
  0xb2   : > { %1327 = vmatmul.mubr.msk.f32.vlgmr.msra.gmra.mrb[2].mxu1 %vm329_vm0, %v282_v2 }
  0xb9   : > { %v1212_v31 = vpop.permute.xlu0 %1211  ;;  %v1133_v38 = vpop.permute.xlu1 %1132 }
 0x181   : > { %v663_v32 = vpop.f32.mrb[0].mxu1  ;;  %v1123_v33 = vpop.f32.mrb[0].mxu0 }
 0x182   : > { %v1335_v34 = vadd.f32 %v1123_v33, %v663_v32  ;;  %v665_v35 = vpop.f32.mrb[1].mxu1  ;;  %v1125_v36 = vpop.f32.mrb[1].mxu0 }
 0x183   : > { %v1336_v37 = vadd.f32 %v1125_v36, %v665_v35 }
 0x184   : > { %v1214_v1 = vadd.f32 %v1335_v34, %v1212_v31 }
 0x185   : > { %v1215_v39 = vadd.f32 %v1336_v37, %v1212_v31  ;;  %v1204_v0 = vpop.f32.mrb[2].mxu1 }
 0x186   : > { %v1216_v40 = vmax.f32 %v1214_v1, 0.0  ;;  %v1205_v41 = vadd.f32 %v1204_v0, %v1133_v38  ;;  %v1206_v42 = vpop.f32.mrb[3].mxu1 }
 0x187   : > { %v1217_v43 = vmax.f32 %v1215_v39, 0.0  ;;  %v1207_v44 = vadd.f32 %v1206_v42, %v1133_v38 }
 0x188   : > { %v1218_v45 = vadd.f32 %v1216_v40, %v1205_v41 }
 0x189   : > { %v1219_v46 = vadd.f32 %v1217_v43, %v1207_v44 }
 0x18a   : > { %1220 = vst [vmem:[%s244_s20] sm:$0xff] %v1218_v45 }
 0x18b   : > { %1221 = vst [vmem:[%s244_s20 + $0x8] sm:$0xff] %v1219_v46 }
 0x18c   : > { %1415 = shalt.err (!%p1412_p3)
}
 0x18d   : > { %s1416_s14 = scalar_lea.hbm %s1708_s9, 256  ;;  %s1420_s17 = scalar_lea.hbm %s1756_s6, 512 }
 0x18e   : > { %p1417_p4 = scmp.ne.s32.totalorder %s1708_s9, %s1416_s14  ;;  %p1421_p9 = scmp.lt.u32.totalorder %s1708_s9, %s1756_s6 }
 0x18f   : > { %p1422_p10 = scmp.lt.u32.totalorder %s1420_s17, %s1416_s14  ;;  %p1424_p12 = scmp.lt.u32.totalorder %s1416_s14, %s1708_s9 }
 0x190   : > { %p1418_p7 = pnand %p1417_p4, %p1550_p5 }
 0x191   : > { %p1423_p11 = por %p1422_p10, %p1421_p9 }
 0x192   : > { %p1419_p8 = pneg %p1418_p7 }
 0x193   : > { %p1425_p13 = por %p1424_p12, %p1423_p11 }
 0x195   : > { %p1426_p0 = pnand %p1425_p13, %p1419_p8 }
 0x197   : > { %1429 = shalt.err (!%p1426_p0)
}
 0x198   : > { %1351 = dma.vmem_to_hbm [thread:$0]  (%p1550_p5), %s1710_s26, 256, %s1708_s9, %s1223_s10  }
 0x199 PF: > { %p1357_p1 = scmp.ge.s32.totalorder %s1464_s24, 2  ;;  %s1249_s20 = sand.u32 1, %s1452_s21  }
 0x19a   : > { %s1250_s28 = scalar_lea.sflag [#allocation3], %s1249_s20 }
 0x19b   : > { %p1354_p2 = pnand %p1357_p1, %p1554_p6 }
 0x19d   : > { %1447 = dma.done.wait (!%p1354_p2), %s1250_s28, 256  }
 0x19e   : > { %1449 = vsyncadd (!%p1354_p2), %s1250_s28, 4294967040  ;;  %p16_p3 = scmp.ge.s32.totalorder %s1537_s27, 4   ;;  %s1759_s21 = smov %s1456_s22 }
 0x19f   : > { %s1760_s22 = smov %s1460_s23  ;;  %s1761_s23 = smov %s1548_s30 }
 0x1a0   : > { %s1762_s24 = smov %s1537_s27  ;;  %18 = sbr.rel (!%p16_p3) target bundleno = 3 (0x3), region = 94 }
 0x1a7   :  { %1255 = vsyncpa [#allocation3], 1 }
 0x1a8   :  { %1257 = vsyncpa [#allocation3 + $0x1], 1 }

</bundles_post_ra>
